<compile_context>
chip_gen: v7x
topology: tpu7x:2x2x1
jax: 0.10.0
libtpu: 0.0.40
codegen_flags: <defaults>
</compile_context>

<pallas_src>
import math
import functools

import jax
import jax.numpy as jnp
from jax.experimental import pallas as pl
from jax.experimental.pallas import tpu as pltpu


def _cdiv(a, b):
    return -(-a // b)


def gnn_cell_kernel(a_in_ref, a_out_ref, h_ref,
                    w_edge_ref, b_edge_ref,
                    w_iha_ref, w_ihb_ref, w_hh_ref,
                    b_gi_ref, b_hh_ref,
                    out_ref, *, tb, n, hdim, step):
    """One grid step processes `tb` graphs (tb*n hidden rows), all GGNN steps."""
    a_in = a_in_ref[...]                                   # (tb, n, n)
    a_out = a_out_ref[...]                                 # (tb, n, n)
    h2 = h_ref[...].astype(jnp.float32)                    # (tb*n, H)

    for _ in range(step):
        # Edge projections for all tb graphs in one MXU call each.
        # Weights are pre-transposed in the wrapper: x @ W.T + b == x @ Wt + b.
        edge_in = (jnp.dot(h2, w_edge_ref[0], preferred_element_type=jnp.float32)
                   + b_edge_ref[0])
        edge_out = (jnp.dot(h2, w_edge_ref[1], preferred_element_type=jnp.float32)
                    + b_edge_ref[1])

        # Per-graph adjacency contraction as one batched MXU einsum. The
        # (tb*n, H) <-> (tb, n, H) reshapes split/merge sublane-aligned rows
        # only (n is a multiple of 8), so they are layout-preserving.
        input_in = jnp.einsum(
            'tij,tjh->tih', a_in, edge_in.reshape(tb, n, hdim),
            preferred_element_type=jnp.float32).reshape(tb * n, hdim)
        input_out = jnp.einsum(
            'tij,tjh->tih', a_out, edge_out.reshape(tb, n, hdim),
            preferred_element_type=jnp.float32).reshape(tb * n, hdim)
        # (b_iah / b_oah were folded into b_gi in the wrapper -- exact algebra.)

        # Per-gate matmuls: each output is exactly one H-wide gate, so no lane
        # slicing of a 3H-wide gi/gh buffer is needed.
        def gates(g):
            gi_g = (jnp.dot(input_in, w_iha_ref[g],
                            preferred_element_type=jnp.float32)
                    + jnp.dot(input_out, w_ihb_ref[g],
                              preferred_element_type=jnp.float32)
                    + b_gi_ref[g])
            gh_g = (jnp.dot(h2, w_hh_ref[g], preferred_element_type=jnp.float32)
                    + b_hh_ref[g])
            return gi_g, gh_g

        gi_r, gh_r = gates(0)
        gi_i, gh_i = gates(1)
        gi_n, gh_n = gates(2)

        reset_gate = jax.nn.sigmoid(gi_r + gh_r)
        input_gate = jax.nn.sigmoid(gi_i + gh_i)
        new_gate = jnp.tanh(gi_n + reset_gate * gh_n)
        h2 = new_gate + input_gate * (h2 - new_gate)

    out_ref[...] = h2.astype(out_ref.dtype)


def _prep_params(params):
    """Pre-transpose / pre-split weights once, outside the kernel."""
    H = params["w_hh"].shape[1]
    w_edge_t = jnp.stack([params["w_edge_in"].T,
                          params["w_edge_out"].T])                       # (2,H,H)
    b_edge = jnp.stack([params["b_edge_in"].reshape(1, H),
                        params["b_edge_out"].reshape(1, H)])             # (2,1,H)

    w_ih = params["w_ih"]                                                # (3H,2H)
    w_iha_t = jnp.stack([w_ih[g * H:(g + 1) * H, :H].T for g in range(3)])   # (3,H,H)
    w_ihb_t = jnp.stack([w_ih[g * H:(g + 1) * H, H:].T for g in range(3)])   # (3,H,H)
    w_hh_t = jnp.stack([params["w_hh"][g * H:(g + 1) * H, :].T
                        for g in range(3)])                              # (3,H,H)

    b_ih3 = params["b_ih"].reshape(3, 1, H)
    b_hh3 = params["b_hh"].reshape(3, 1, H)
    b_iah = params["b_iah"].reshape(1, H)
    b_oah = params["b_oah"].reshape(1, H)
    # Exact fold of b_iah / b_oah into the gi bias:
    #   (A@e_in + b_iah) @ Wa.T + (A@e_out + b_oah) @ Wb.T + b_ih
    # = (A@e_in) @ Wa.T + (A@e_out) @ Wb.T + (b_ih + b_iah@Wa.T + b_oah@Wb.T)
    b_gi = (b_ih3
            + jnp.einsum("xh,ghk->gxk", b_iah, w_iha_t)
            + jnp.einsum("xh,ghk->gxk", b_oah, w_ihb_t))                 # (3,1,H)

    return dict(w_edge_t=w_edge_t, b_edge=b_edge,
                w_iha_t=w_iha_t, w_ihb_t=w_ihb_t, w_hh_t=w_hh_t,
                b_gi=b_gi, b_hh=b_hh3)


def gnn_cell(A_in, A_out, hidden2, w, *, tb, n, step):
    """hidden2: (B*n, H) row-flattened hidden; A_in/A_out: (B, n, n)."""
    BN, H = hidden2.shape
    B = A_in.shape[0]
    assert BN == B * n and B % tb == 0
    grid = (B // tb,)

    def wspec(arr):
        zeros = (0,) * arr.ndim
        return pl.BlockSpec(arr.shape, lambda b: zeros)

    kernel = functools.partial(gnn_cell_kernel, tb=tb, n=n, hdim=H, step=step)

    return pl.pallas_call(
        kernel,
        out_shape=jax.ShapeDtypeStruct((BN, H), hidden2.dtype),
        grid_spec=pltpu.PrefetchScalarGridSpec(
            num_scalar_prefetch=0,
            grid=grid,
            in_specs=[
                pl.BlockSpec((tb, n, n), lambda b: (b, 0, 0)),   # A_in
                pl.BlockSpec((tb, n, n), lambda b: (b, 0, 0)),   # A_out
                pl.BlockSpec((tb * n, H), lambda b: (b, 0)),     # hidden rows
                wspec(w["w_edge_t"]),
                wspec(w["b_edge"]),
                wspec(w["w_iha_t"]),
                wspec(w["w_ihb_t"]),
                wspec(w["w_hh_t"]),
                wspec(w["b_gi"]),
                wspec(w["b_hh"]),
            ],
            out_specs=pl.BlockSpec((tb * n, H), lambda b: (b, 0)),
        ),
        compiler_params=pltpu.CompilerParams(
            dimension_semantics=("parallel",)),
    )(A_in, A_out, hidden2,
      w["w_edge_t"], w["b_edge"], w["w_iha_t"], w["w_ihb_t"],
      w["w_hh_t"], w["b_gi"], w["b_hh"])


def ggnn_forward(alias_inputs, A, items, params, step=1):
    # Embedding lookup (glue, plain JAX).
    hidden = params["embedding"][items]              # (B, N, H)
    B, N, H = hidden.shape

    # Split adjacency once in the wrapper (lane-dense inputs for the kernel).
    A_in = A[:, :, :N]
    A_out = A[:, :, N:2 * N]

    # Pad the node axis to a multiple of 8 (sublane) so row slices / blocks
    # are tile-aligned. Zero-padded A rows/cols never leak into real nodes.
    Np = _cdiv(N, 8) * 8
    if Np != N:
        dn = Np - N
        hidden = jnp.pad(hidden, ((0, 0), (0, dn), (0, 0)))
        A_in = jnp.pad(A_in, ((0, 0), (0, dn), (0, dn)))
        A_out = jnp.pad(A_out, ((0, 0), (0, dn), (0, dn)))

    # Batch several graphs per grid step so weight matmuls see >= ~256 rows.
    tb = max(1, min(B, _cdiv(256, Np)))
    Bp = _cdiv(B, tb) * tb
    if Bp != B:
        db = Bp - B
        hidden = jnp.pad(hidden, ((0, db), (0, 0), (0, 0)))
        A_in = jnp.pad(A_in, ((0, db), (0, 0), (0, 0)))
        A_out = jnp.pad(A_out, ((0, db), (0, 0), (0, 0)))

    hidden2 = hidden.reshape(Bp * Np, H)
    w = _prep_params(params)
    # All GGNN propagation steps run inside one pallas_call (no HBM round trip).
    hidden2 = gnn_cell(A_in, A_out, hidden2, w, tb=tb, n=Np, step=step)

    hidden = hidden2.reshape(Bp, Np, H)[:B, :N, :]
    # seq_hidden[b] = hidden[b][alias_inputs[b]]  (glue, plain JAX)
    seq_hidden = jax.vmap(lambda h, idx: h[idx])(hidden, alias_inputs)
    return seq_hidden


def init_params(key, hidden_size, vocab_size):
    H = hidden_size
    stdv = 1.0 / math.sqrt(H)
    keys = jax.random.split(key, 12)
    u = lambda k, shape: jax.random.uniform(
        k, shape, dtype=jnp.float32, minval=-stdv, maxval=stdv)
    return {
        "w_ih": u(keys[0], (3 * H, 2 * H)),
        "w_hh": u(keys[1], (3 * H, H)),
        "b_ih": u(keys[2], (1, 3 * H)),
        "b_hh": u(keys[3], (1, 3 * H)),
        "b_iah": u(keys[4], (1, H)),
        "b_oah": u(keys[5], (1, H)),
        "w_edge_in": u(keys[6], (H, H)),
        "b_edge_in": u(keys[7], (1, H)),
        "w_edge_out": u(keys[8], (H, H)),
        "b_edge_out": u(keys[9], (1, H)),
        # TODO(synk): self.embedding is referenced in forward() but never defined
        # in __init__; a deterministic (vocab, H) table is synthesized here.
        "embedding": u(keys[10], (vocab_size, H)),
    }


def reference_forward(alias_inputs, A, items, params, step=1):
    hidden = params["embedding"][items]
    N = A.shape[1]
    for _ in range(step):
        edge_in = hidden @ params["w_edge_in"].T + params["b_edge_in"]
        edge_out = hidden @ params["w_edge_out"].T + params["b_edge_out"]
        input_in = jnp.matmul(A[:, :, :N], edge_in) + params["b_iah"]
        input_out = jnp.matmul(A[:, :, N:2 * N], edge_out) + params["b_oah"]
        inputs = jnp.concatenate([input_in, input_out], axis=2)
        gi = inputs @ params["w_ih"].T + params["b_ih"]
        gh = hidden @ params["w_hh"].T + params["b_hh"]
        i_r, i_i, i_n = jnp.split(gi, 3, axis=2)
        h_r, h_i, h_n = jnp.split(gh, 3, axis=2)
        reset_gate = jax.nn.sigmoid(i_r + h_r)
        input_gate = jax.nn.sigmoid(i_i + h_i)
        new_gate = jnp.tanh(i_n + reset_gate * h_n)
        hidden = new_gate + input_gate * (hidden - new_gate)
    return jax.vmap(lambda h, idx: h[idx])(hidden, alias_inputs)


if __name__ == "__main__":
    B, N, H, L = 2, 8, 32, 8     # batch, nodes, hidden, sequence length
    VOCAB = 20
    STEP = 1

    key = jax.random.PRNGKey(0)
    k_p, k_a, k_items, k_alias = jax.random.split(key, 4)

    params = init_params(k_p, H, VOCAB)

    # Row-normalized-ish adjacency [B, N, 2N].
    A = (jax.random.uniform(k_a, (B, N, 2 * N), dtype=jnp.float32)
         < 0.3).astype(jnp.float32)
    A = A / jnp.maximum(A.sum(axis=2, keepdims=True), 1.0)

    items = jax.random.randint(k_items, (B, N), 0, VOCAB, dtype=jnp.int32)
    alias_inputs = jax.random.randint(k_alias, (B, L), 0, N, dtype=jnp.int32)

    fwd = jax.jit(functools.partial(ggnn_forward, step=STEP))
    out = fwd(alias_inputs, A, items, params)
    out = jax.block_until_ready(out)

    ref = reference_forward(alias_inputs, A, items, params, step=STEP)
    assert out.shape == (B, L, H), out.shape
    assert jnp.allclose(out, ref, rtol=1e-2, atol=1e-2), \
        float(jnp.max(jnp.abs(out - ref)))

    print("KERNEL_OK")
</pallas_src>

<mosaic_0001>
module attributes {stable_mosaic.version = 11 : i64} {
  func.func @gnn_cell_kernel(%arg0: i32, %arg1: memref<2x8x8xf32, #tpu.memory_space<vmem>>, %arg2: memref<2x8x8xf32, #tpu.memory_space<vmem>>, %arg3: memref<16x32xf32, #tpu.memory_space<vmem>>, %arg4: memref<2x32x32xf32, #tpu.memory_space<vmem>>, %arg5: memref<2x1x32xf32, #tpu.memory_space<vmem>>, %arg6: memref<3x32x32xf32, #tpu.memory_space<vmem>>, %arg7: memref<3x32x32xf32, #tpu.memory_space<vmem>>, %arg8: memref<3x32x32xf32, #tpu.memory_space<vmem>>, %arg9: memref<3x1x32xf32, #tpu.memory_space<vmem>>, %arg10: memref<3x1x32xf32, #tpu.memory_space<vmem>>, %arg11: memref<16x32xf32, #tpu.memory_space<vmem>>) attributes {dimension_semantics = [#tpu.dimension_semantics<parallel>], iteration_bounds = array<i64: 1>, scalar_prefetch = 0 : i64, scratch_operands = 0 : i64, tpu.core_type = #tpu.core_type<tc>, window_params = [{transform_indices = @transform_0, window_bounds = array<i64: 2, 8, 8>}, {transform_indices = @transform_1, window_bounds = array<i64: 2, 8, 8>}, {transform_indices = @transform_2, window_bounds = array<i64: 16, 32>}, {pipeline_mode = #tpu.pipeline_mode<synchronous>, transform_indices = @transform_3, window_bounds = array<i64: 2, 32, 32>}, {pipeline_mode = #tpu.pipeline_mode<synchronous>, transform_indices = @transform_4, window_bounds = array<i64: 2, 1, 32>}, {pipeline_mode = #tpu.pipeline_mode<synchronous>, transform_indices = @transform_5, window_bounds = array<i64: 3, 32, 32>}, {pipeline_mode = #tpu.pipeline_mode<synchronous>, transform_indices = @transform_6, window_bounds = array<i64: 3, 32, 32>}, {pipeline_mode = #tpu.pipeline_mode<synchronous>, transform_indices = @transform_7, window_bounds = array<i64: 3, 32, 32>}, {pipeline_mode = #tpu.pipeline_mode<synchronous>, transform_indices = @transform_8, window_bounds = array<i64: 3, 1, 32>}, {pipeline_mode = #tpu.pipeline_mode<synchronous>, transform_indices = @transform_9, window_bounds = array<i64: 3, 1, 32>}, {transform_indices = @transform_10, window_bounds = array<i64: 16, 32>}]} {
    %c0 = arith.constant 0 : index
    %c0_0 = arith.constant 0 : index
    %c0_1 = arith.constant 0 : index
    %0 = vector.load %arg1[%c0, %c0_0, %c0_1] : memref<2x8x8xf32, #tpu.memory_space<vmem>>, vector<2x8x8xf32>
    %c0_2 = arith.constant 0 : index
    %c0_3 = arith.constant 0 : index
    %c0_4 = arith.constant 0 : index
    %1 = vector.load %arg2[%c0_2, %c0_3, %c0_4] : memref<2x8x8xf32, #tpu.memory_space<vmem>>, vector<2x8x8xf32>
    %c0_5 = arith.constant 0 : index
    %c0_6 = arith.constant 0 : index
    %2 = vector.load %arg3[%c0_5, %c0_6] : memref<16x32xf32, #tpu.memory_space<vmem>>, vector<16x32xf32>
    %c0_7 = arith.constant 0 : index
    %c0_8 = arith.constant 0 : index
    %c0_9 = arith.constant 0 : index
    %3 = vector.load %arg4[%c0_7, %c0_8, %c0_9] : memref<2x32x32xf32, #tpu.memory_space<vmem>>, vector<1x32x32xf32>
    %4 = vector.shape_cast %3 : vector<1x32x32xf32> to vector<32x32xf32>
    %cst = arith.constant dense<0.000000e+00> : vector<16x32xf32>
    %5 = tpu.matmul %2, %4, %cst {dimension_numbers = #tpu.dot_dimension_numbers<[1], [0], [0], [1], [0, 0, 1, 1], [], []>} : vector<16x32xf32>, vector<32x32xf32>, vector<16x32xf32> -> vector<16x32xf32>
    %c0_10 = arith.constant 0 : index
    %c0_11 = arith.constant 0 : index
    %c0_12 = arith.constant 0 : index
    %6 = vector.load %arg5[%c0_10, %c0_11, %c0_12] : memref<2x1x32xf32, #tpu.memory_space<vmem>>, vector<1x1x32xf32>
    %7 = vector.shape_cast %6 : vector<1x1x32xf32> to vector<1x32xf32>
    %8 = vector.broadcast %7 : vector<1x32xf32> to vector<16x32xf32>
    %9 = arith.addf %5, %8 : vector<16x32xf32>
    %c1 = arith.constant 1 : index
    %c0_13 = arith.constant 0 : index
    %c0_14 = arith.constant 0 : index
    %10 = vector.load %arg4[%c1, %c0_13, %c0_14] : memref<2x32x32xf32, #tpu.memory_space<vmem>>, vector<1x32x32xf32>
    %11 = vector.shape_cast %10 : vector<1x32x32xf32> to vector<32x32xf32>
    %cst_15 = arith.constant dense<0.000000e+00> : vector<16x32xf32>
    %12 = tpu.matmul %2, %11, %cst_15 {dimension_numbers = #tpu.dot_dimension_numbers<[1], [0], [0], [1], [0, 0, 1, 1], [], []>} : vector<16x32xf32>, vector<32x32xf32>, vector<16x32xf32> -> vector<16x32xf32>
    %c1_16 = arith.constant 1 : index
    %c0_17 = arith.constant 0 : index
    %c0_18 = arith.constant 0 : index
    %13 = vector.load %arg5[%c1_16, %c0_17, %c0_18] : memref<2x1x32xf32, #tpu.memory_space<vmem>>, vector<1x1x32xf32>
    %14 = vector.shape_cast %13 : vector<1x1x32xf32> to vector<1x32xf32>
    %15 = vector.broadcast %14 : vector<1x32xf32> to vector<16x32xf32>
    %16 = arith.addf %12, %15 : vector<16x32xf32>
    %17 = vector.shape_cast %9 : vector<16x32xf32> to vector<2x8x32xf32>
    "tpu.trace_start"() <{level = 10 : i32, message = "tij,tjh->tih"}> : () -> ()
    %cst_19 = arith.constant dense<0.000000e+00> : vector<2x8x32xf32>
    %18 = tpu.matmul %0, %17, %cst_19 {dimension_numbers = #tpu.dot_dimension_numbers<[2], [1], [1], [2], [0, 0, 0, 1, 1, 2], [0], [0]>} : vector<2x8x8xf32>, vector<2x8x32xf32>, vector<2x8x32xf32> -> vector<2x8x32xf32>
    "tpu.trace_stop"() : () -> ()
    %19 = vector.shape_cast %18 : vector<2x8x32xf32> to vector<16x32xf32>
    %20 = vector.shape_cast %16 : vector<16x32xf32> to vector<2x8x32xf32>
    "tpu.trace_start"() <{level = 10 : i32, message = "tij,tjh->tih"}> : () -> ()
    %cst_20 = arith.constant dense<0.000000e+00> : vector<2x8x32xf32>
    %21 = tpu.matmul %1, %20, %cst_20 {dimension_numbers = #tpu.dot_dimension_numbers<[2], [1], [1], [2], [0, 0, 0, 1, 1, 2], [0], [0]>} : vector<2x8x8xf32>, vector<2x8x32xf32>, vector<2x8x32xf32> -> vector<2x8x32xf32>
    "tpu.trace_stop"() : () -> ()
    %22 = vector.shape_cast %21 : vector<2x8x32xf32> to vector<16x32xf32>
    %c0_21 = arith.constant 0 : index
    %c0_22 = arith.constant 0 : index
    %c0_23 = arith.constant 0 : index
    %23 = vector.load %arg6[%c0_21, %c0_22, %c0_23] : memref<3x32x32xf32, #tpu.memory_space<vmem>>, vector<1x32x32xf32>
    %24 = vector.shape_cast %23 : vector<1x32x32xf32> to vector<32x32xf32>
    %cst_24 = arith.constant dense<0.000000e+00> : vector<16x32xf32>
    %25 = tpu.matmul %19, %24, %cst_24 {dimension_numbers = #tpu.dot_dimension_numbers<[1], [0], [0], [1], [0, 0, 1, 1], [], []>} : vector<16x32xf32>, vector<32x32xf32>, vector<16x32xf32> -> vector<16x32xf32>
    %c0_25 = arith.constant 0 : index
    %c0_26 = arith.constant 0 : index
    %c0_27 = arith.constant 0 : index
    %26 = vector.load %arg7[%c0_25, %c0_26, %c0_27] : memref<3x32x32xf32, #tpu.memory_space<vmem>>, vector<1x32x32xf32>
    %27 = vector.shape_cast %26 : vector<1x32x32xf32> to vector<32x32xf32>
    %cst_28 = arith.constant dense<0.000000e+00> : vector<16x32xf32>
    %28 = tpu.matmul %22, %27, %cst_28 {dimension_numbers = #tpu.dot_dimension_numbers<[1], [0], [0], [1], [0, 0, 1, 1], [], []>} : vector<16x32xf32>, vector<32x32xf32>, vector<16x32xf32> -> vector<16x32xf32>
    %29 = arith.addf %25, %28 : vector<16x32xf32>
    %c0_29 = arith.constant 0 : index
    %c0_30 = arith.constant 0 : index
    %c0_31 = arith.constant 0 : index
    %30 = vector.load %arg9[%c0_29, %c0_30, %c0_31] : memref<3x1x32xf32, #tpu.memory_space<vmem>>, vector<1x1x32xf32>
    %31 = vector.shape_cast %30 : vector<1x1x32xf32> to vector<1x32xf32>
    %32 = vector.broadcast %31 : vector<1x32xf32> to vector<16x32xf32>
    %33 = arith.addf %29, %32 : vector<16x32xf32>
    %c0_32 = arith.constant 0 : index
    %c0_33 = arith.constant 0 : index
    %c0_34 = arith.constant 0 : index
    %34 = vector.load %arg8[%c0_32, %c0_33, %c0_34] : memref<3x32x32xf32, #tpu.memory_space<vmem>>, vector<1x32x32xf32>
    %35 = vector.shape_cast %34 : vector<1x32x32xf32> to vector<32x32xf32>
    %cst_35 = arith.constant dense<0.000000e+00> : vector<16x32xf32>
    %36 = tpu.matmul %2, %35, %cst_35 {dimension_numbers = #tpu.dot_dimension_numbers<[1], [0], [0], [1], [0, 0, 1, 1], [], []>} : vector<16x32xf32>, vector<32x32xf32>, vector<16x32xf32> -> vector<16x32xf32>
    %c0_36 = arith.constant 0 : index
    %c0_37 = arith.constant 0 : index
    %c0_38 = arith.constant 0 : index
    %37 = vector.load %arg10[%c0_36, %c0_37, %c0_38] : memref<3x1x32xf32, #tpu.memory_space<vmem>>, vector<1x1x32xf32>
    %38 = vector.shape_cast %37 : vector<1x1x32xf32> to vector<1x32xf32>
    %39 = vector.broadcast %38 : vector<1x32xf32> to vector<16x32xf32>
    %40 = arith.addf %36, %39 : vector<16x32xf32>
    %c1_39 = arith.constant 1 : index
    %c0_40 = arith.constant 0 : index
    %c0_41 = arith.constant 0 : index
    %41 = vector.load %arg6[%c1_39, %c0_40, %c0_41] : memref<3x32x32xf32, #tpu.memory_space<vmem>>, vector<1x32x32xf32>
    %42 = vector.shape_cast %41 : vector<1x32x32xf32> to vector<32x32xf32>
    %cst_42 = arith.constant dense<0.000000e+00> : vector<16x32xf32>
    %43 = tpu.matmul %19, %42, %cst_42 {dimension_numbers = #tpu.dot_dimension_numbers<[1], [0], [0], [1], [0, 0, 1, 1], [], []>} : vector<16x32xf32>, vector<32x32xf32>, vector<16x32xf32> -> vector<16x32xf32>
    %c1_43 = arith.constant 1 : index
    %c0_44 = arith.constant 0 : index
    %c0_45 = arith.constant 0 : index
    %44 = vector.load %arg7[%c1_43, %c0_44, %c0_45] : memref<3x32x32xf32, #tpu.memory_space<vmem>>, vector<1x32x32xf32>
    %45 = vector.shape_cast %44 : vector<1x32x32xf32> to vector<32x32xf32>
    %cst_46 = arith.constant dense<0.000000e+00> : vector<16x32xf32>
    %46 = tpu.matmul %22, %45, %cst_46 {dimension_numbers = #tpu.dot_dimension_numbers<[1], [0], [0], [1], [0, 0, 1, 1], [], []>} : vector<16x32xf32>, vector<32x32xf32>, vector<16x32xf32> -> vector<16x32xf32>
    %47 = arith.addf %43, %46 : vector<16x32xf32>
    %c1_47 = arith.constant 1 : index
    %c0_48 = arith.constant 0 : index
    %c0_49 = arith.constant 0 : index
    %48 = vector.load %arg9[%c1_47, %c0_48, %c0_49] : memref<3x1x32xf32, #tpu.memory_space<vmem>>, vector<1x1x32xf32>
    %49 = vector.shape_cast %48 : vector<1x1x32xf32> to vector<1x32xf32>
    %50 = vector.broadcast %49 : vector<1x32xf32> to vector<16x32xf32>
    %51 = arith.addf %47, %50 : vector<16x32xf32>
    %c1_50 = arith.constant 1 : index
    %c0_51 = arith.constant 0 : index
    %c0_52 = arith.constant 0 : index
    %52 = vector.load %arg8[%c1_50, %c0_51, %c0_52] : memref<3x32x32xf32, #tpu.memory_space<vmem>>, vector<1x32x32xf32>
    %53 = vector.shape_cast %52 : vector<1x32x32xf32> to vector<32x32xf32>
    %cst_53 = arith.constant dense<0.000000e+00> : vector<16x32xf32>
    %54 = tpu.matmul %2, %53, %cst_53 {dimension_numbers = #tpu.dot_dimension_numbers<[1], [0], [0], [1], [0, 0, 1, 1], [], []>} : vector<16x32xf32>, vector<32x32xf32>, vector<16x32xf32> -> vector<16x32xf32>
    %c1_54 = arith.constant 1 : index
    %c0_55 = arith.constant 0 : index
    %c0_56 = arith.constant 0 : index
    %55 = vector.load %arg10[%c1_54, %c0_55, %c0_56] : memref<3x1x32xf32, #tpu.memory_space<vmem>>, vector<1x1x32xf32>
    %56 = vector.shape_cast %55 : vector<1x1x32xf32> to vector<1x32xf32>
    %57 = vector.broadcast %56 : vector<1x32xf32> to vector<16x32xf32>
    %58 = arith.addf %54, %57 : vector<16x32xf32>
    %c2 = arith.constant 2 : index
    %c0_57 = arith.constant 0 : index
    %c0_58 = arith.constant 0 : index
    %59 = vector.load %arg6[%c2, %c0_57, %c0_58] : memref<3x32x32xf32, #tpu.memory_space<vmem>>, vector<1x32x32xf32>
    %60 = vector.shape_cast %59 : vector<1x32x32xf32> to vector<32x32xf32>
    %cst_59 = arith.constant dense<0.000000e+00> : vector<16x32xf32>
    %61 = tpu.matmul %19, %60, %cst_59 {dimension_numbers = #tpu.dot_dimension_numbers<[1], [0], [0], [1], [0, 0, 1, 1], [], []>} : vector<16x32xf32>, vector<32x32xf32>, vector<16x32xf32> -> vector<16x32xf32>
    %c2_60 = arith.constant 2 : index
    %c0_61 = arith.constant 0 : index
    %c0_62 = arith.constant 0 : index
    %62 = vector.load %arg7[%c2_60, %c0_61, %c0_62] : memref<3x32x32xf32, #tpu.memory_space<vmem>>, vector<1x32x32xf32>
    %63 = vector.shape_cast %62 : vector<1x32x32xf32> to vector<32x32xf32>
    %cst_63 = arith.constant dense<0.000000e+00> : vector<16x32xf32>
    %64 = tpu.matmul %22, %63, %cst_63 {dimension_numbers = #tpu.dot_dimension_numbers<[1], [0], [0], [1], [0, 0, 1, 1], [], []>} : vector<16x32xf32>, vector<32x32xf32>, vector<16x32xf32> -> vector<16x32xf32>
    %65 = arith.addf %61, %64 : vector<16x32xf32>
    %c2_64 = arith.constant 2 : index
    %c0_65 = arith.constant 0 : index
    %c0_66 = arith.constant 0 : index
    %66 = vector.load %arg9[%c2_64, %c0_65, %c0_66] : memref<3x1x32xf32, #tpu.memory_space<vmem>>, vector<1x1x32xf32>
    %67 = vector.shape_cast %66 : vector<1x1x32xf32> to vector<1x32xf32>
    %68 = vector.broadcast %67 : vector<1x32xf32> to vector<16x32xf32>
    %69 = arith.addf %65, %68 : vector<16x32xf32>
    %c2_67 = arith.constant 2 : index
    %c0_68 = arith.constant 0 : index
    %c0_69 = arith.constant 0 : index
    %70 = vector.load %arg8[%c2_67, %c0_68, %c0_69] : memref<3x32x32xf32, #tpu.memory_space<vmem>>, vector<1x32x32xf32>
    %71 = vector.shape_cast %70 : vector<1x32x32xf32> to vector<32x32xf32>
    %cst_70 = arith.constant dense<0.000000e+00> : vector<16x32xf32>
    %72 = tpu.matmul %2, %71, %cst_70 {dimension_numbers = #tpu.dot_dimension_numbers<[1], [0], [0], [1], [0, 0, 1, 1], [], []>} : vector<16x32xf32>, vector<32x32xf32>, vector<16x32xf32> -> vector<16x32xf32>
    %c2_71 = arith.constant 2 : index
    %c0_72 = arith.constant 0 : index
    %c0_73 = arith.constant 0 : index
    %73 = vector.load %arg10[%c2_71, %c0_72, %c0_73] : memref<3x1x32xf32, #tpu.memory_space<vmem>>, vector<1x1x32xf32>
    %74 = vector.shape_cast %73 : vector<1x1x32xf32> to vector<1x32xf32>
    %75 = vector.broadcast %74 : vector<1x32xf32> to vector<16x32xf32>
    %76 = arith.addf %72, %75 : vector<16x32xf32>
    %77 = arith.addf %33, %40 : vector<16x32xf32>
    %78 = arith.negf %77 : vector<16x32xf32>
    %79 = math.exp %78 : vector<16x32xf32>
    %cst_74 = arith.constant 1.000000e+00 : f32
    %80 = vector.broadcast %cst_74 : f32 to vector<16x32xf32>
    %81 = arith.addf %80, %79 : vector<16x32xf32>
    %82 = arith.divf %80, %81 : vector<16x32xf32>
    %83 = arith.addf %51, %58 : vector<16x32xf32>
    %84 = arith.negf %83 : vector<16x32xf32>
    %85 = math.exp %84 : vector<16x32xf32>
    %cst_75 = arith.constant 1.000000e+00 : f32
    %86 = vector.broadcast %cst_75 : f32 to vector<16x32xf32>
    %87 = arith.addf %86, %85 : vector<16x32xf32>
    %88 = arith.divf %86, %87 : vector<16x32xf32>
    %89 = arith.mulf %82, %76 : vector<16x32xf32>
    %90 = arith.addf %69, %89 : vector<16x32xf32>
    %91 = math.tanh %90 : vector<16x32xf32>
    %92 = arith.subf %2, %91 : vector<16x32xf32>
    %93 = arith.mulf %88, %92 : vector<16x32xf32>
    %94 = arith.addf %91, %93 : vector<16x32xf32>
    %c0_76 = arith.constant 0 : index
    %c0_77 = arith.constant 0 : index
    %95 = vector.load %arg11[%c0_76, %c0_77] : memref<16x32xf32, #tpu.memory_space<vmem>>, vector<16x32xf32>
    tpu.vector_store %arg11[%c0_76, %c0_77], %94 {strides = array<i32>} : memref<16x32xf32, #tpu.memory_space<vmem>>, vector<16x32xf32>,
    return
  }
  func.func @transform_0(%arg0: i32) -> (i32, i32, i32) {
    %c0_i32 = arith.constant 0 : i32
    %c0_i32_0 = arith.constant 0 : i32
    %c0_i32_1 = arith.constant 0 : i32
    return %arg0, %c0_i32, %c0_i32_0 : i32, i32, i32
  }
  func.func @transform_1(%arg0: i32) -> (i32, i32, i32) {
    %c0_i32 = arith.constant 0 : i32
    %c0_i32_0 = arith.constant 0 : i32
    %c0_i32_1 = arith.constant 0 : i32
    return %arg0, %c0_i32, %c0_i32_0 : i32, i32, i32
  }
  func.func @transform_2(%arg0: i32) -> (i32, i32) {
    %c0_i32 = arith.constant 0 : i32
    %c0_i32_0 = arith.constant 0 : i32
    return %arg0, %c0_i32 : i32, i32
  }
  func.func @transform_3(%arg0: i32) -> (i32, i32, i32) {
    %c0_i32 = arith.constant 0 : i32
    %c0_i32_0 = arith.constant 0 : i32
    %c0_i32_1 = arith.constant 0 : i32
    %c0_i32_2 = arith.constant 0 : i32
    return %c0_i32, %c0_i32_0, %c0_i32_1 : i32, i32, i32
  }
  func.func @transform_4(%arg0: i32) -> (i32, i32, i32) {
    %c0_i32 = arith.constant 0 : i32
    %c0_i32_0 = arith.constant 0 : i32
    %c0_i32_1 = arith.constant 0 : i32
    %c0_i32_2 = arith.constant 0 : i32
    return %c0_i32, %c0_i32_0, %c0_i32_1 : i32, i32, i32
  }
  func.func @transform_5(%arg0: i32) -> (i32, i32, i32) {
    %c0_i32 = arith.constant 0 : i32
    %c0_i32_0 = arith.constant 0 : i32
    %c0_i32_1 = arith.constant 0 : i32
    %c0_i32_2 = arith.constant 0 : i32
    return %c0_i32, %c0_i32_0, %c0_i32_1 : i32, i32, i32
  }
  func.func @transform_6(%arg0: i32) -> (i32, i32, i32) {
    %c0_i32 = arith.constant 0 : i32
    %c0_i32_0 = arith.constant 0 : i32
    %c0_i32_1 = arith.constant 0 : i32
    %c0_i32_2 = arith.constant 0 : i32
    return %c0_i32, %c0_i32_0, %c0_i32_1 : i32, i32, i32
  }
  func.func @transform_7(%arg0: i32) -> (i32, i32, i32) {
    %c0_i32 = arith.constant 0 : i32
    %c0_i32_0 = arith.constant 0 : i32
    %c0_i32_1 = arith.constant 0 : i32
    %c0_i32_2 = arith.constant 0 : i32
    return %c0_i32, %c0_i32_0, %c0_i32_1 : i32, i32, i32
  }
  func.func @transform_8(%arg0: i32) -> (i32, i32, i32) {
    %c0_i32 = arith.constant 0 : i32
    %c0_i32_0 = arith.constant 0 : i32
    %c0_i32_1 = arith.constant 0 : i32
    %c0_i32_2 = arith.constant 0 : i32
    return %c0_i32, %c0_i32_0, %c0_i32_1 : i32, i32, i32
  }
  func.func @transform_9(%arg0: i32) -> (i32, i32, i32) {
    %c0_i32 = arith.constant 0 : i32
    %c0_i32_0 = arith.constant 0 : i32
    %c0_i32_1 = arith.constant 0 : i32
    %c0_i32_2 = arith.constant 0 : i32
    return %c0_i32, %c0_i32_0, %c0_i32_1 : i32, i32, i32
  }
  func.func @transform_10(%arg0: i32) -> (i32, i32) {
    %c0_i32 = arith.constant 0 : i32
    %c0_i32_0 = arith.constant 0 : i32
    return %arg0, %c0_i32 : i32, i32
  }
}

</mosaic_0001>

<bundles_post_ra>
// kernel: ggnn_forward.1
= control target key start
LH: loop header
LB: loop body
LE: loop exit
PB: predicated region body
PF: predicated region fallthrough
CT: control target
= control target key end

     0   :  { %vm52_vm0 = vcmask 261120   ;;  %v1756_v14 = vmov 0.0   ;;  %vm1757_vm1 = vmmov 0   ;;  %vm222_vm2 = vcmask 64512   ;;  %s2061_s3 = inlined_call_operand.vmem [shape: f32[2,32,32], index: 3, kind: input, shape index: {}]   ;;  %s2062_s2 = inlined_call_operand.vmem [shape: f32[16,32], index: 2, kind: input, shape index: {}]   ;;  %s2063_s4 = inlined_call_operand.vmem [shape: f32[2,1,32], index: 4, kind: input, shape index: {}]   ;;  %s2064_s6 = inlined_call_operand.vmem [shape: f32[3,32,32], index: 6, kind: input, shape index: {}]   ;;  %s2065_s0 = inlined_call_operand.vmem [shape: f32[2,8,8], index: 0, kind: input, shape index: {}]   ;;  %s2066_s1 = inlined_call_operand.vmem [shape: f32[2,8,8], index: 1, kind: input, shape index: {}]   ;;  %s2067_s5 = inlined_call_operand.vmem [shape: f32[3,32,32], index: 5, kind: input, shape index: {}]   ;;  %s2068_s7 = inlined_call_operand.vmem [shape: f32[3,32,32], index: 7, kind: input, shape index: {}]   ;;  %s2069_s8 = inlined_call_operand.vmem [shape: f32[3,1,32], index: 8, kind: input, shape index: {}]   ;;  %s2070_s9 = inlined_call_operand.vmem [shape: f32[3,1,32], index: 9, kind: input, shape index: {}]   ;;  %s2071_s10 = inlined_call_operand.vmem [shape: f32[16,32], index: 10, kind: output, shape index: {}]  }
   0x1   :  { %v41_v0 = vld [vmem:[%s2061_s3] sm:$0xff]  ;;  %v42_v1 = vld [vmem:[%s2061_s3 + $0x8] sm:$0xff]  ;;  %v43_v2 = vld [vmem:[%s2061_s3 + $0x10] sm:$0xff] }
   0x2   :  { %v1628_v3 = vpack.c.bf16 %v42_v1, %v41_v0  ;;  %v44_v4 = vld [vmem:[%s2061_s3 + $0x18] sm:$0xff]  ;;  %v1345_v5 = vld [vmem:[%s2061_s3 + $0x20] sm:$0xff]  ;;  %v1346_v6 = vld [vmem:[%s2061_s3 + $0x28] sm:$0xff] }
   0x3   :  { %v1632_v7 = vpack.c.bf16 %v44_v4, %v43_v2  ;;  %v1636_v8 = vpack.c.bf16 %v1346_v6, %v1345_v5  ;;  %v1834_v9 = vld [vmem:[%s2062_s2] sm:$0xff]  ;;  %v1347_v10 = vld [vmem:[%s2061_s3 + $0x30] sm:$0xff]  ;;  %v1348_v11 = vld [vmem:[%s2061_s3 + $0x38] sm:$0xff] }
   0x4   :  { %1629 = vmatprep.subr.bf16.mxu0 %v1628_v3  ;;  %1495 = vmatprep.mubr.msk.f32.mxu0 %vm52_vm0, %v1834_v9  ;;  %v1640_v12 = vpack.c.bf16 %v1348_v11, %v1347_v10  ;;  %v1849_v13 = vld [vmem:[%s2062_s2 + $0x8] sm:$0xff]  ;;  %v1342_v15 = vld [vmem:[%s2063_s4] ss:$0 sm:$0xff]  ;;  %v1350_v17 = vld [vmem:[%s2063_s4 + $0x1] ss:$0 sm:$0xff] }
   0x5   :  { %1631 = vmatpush3.bf16.msra.mxu0 %v1628_v3  ;;  %1637 = vmatprep.subr.bf16.mxu1 %v1636_v8  ;;  %v519_v20 = vld [vmem:[%s2064_s6] sm:$0xff]  ;;  %v520_v21 = vld [vmem:[%s2064_s6 + $0x8] sm:$0xff]  ;;  %v521_v35 = vld [vmem:[%s2064_s6 + $0x10] sm:$0xff] }
   0x6   :  { %1633 = vmatprep.subr.bf16.mxu0 %v1632_v7  ;;  %1639 = vmatpush3.bf16.msra.mxu1 %v1636_v8  ;;  %v35_v23 = vld [vmem:[%s2065_s0] sm:$0xff]  ;;  %v1644_v27 = vpack.c.bf16 %v520_v21, %v519_v20  ;;  %v1370_v29 = vld [vmem:[%s2064_s6 + $0x28] sm:$0xff]  ;;  %v522_v36 = vld [vmem:[%s2064_s6 + $0x18] sm:$0xff] }
   0x7   :  { %1641 = vmatprep.subr.bf16.mxu1 %v1640_v12  ;;  %1506 = vmatprep.mubr.msk.f32.mxu1 %vm52_vm0, %v1834_v9  ;;  %v1369_v28 = vld [vmem:[%s2064_s6 + $0x20] sm:$0xff]  ;;  %v36_v32 = vld [vmem:[%s2065_s0 + $0x8] sm:$0xff]  ;;  %v1371_v37 = vld [vmem:[%s2064_s6 + $0x30] sm:$0xff]  ;;  %v1648_v38 = vpack.c.bf16 %v522_v36, %v521_v35 }
   0x8   :  { %v37_v30 = vld [vmem:[%s2066_s1] sm:$0xff]  ;;  %v1668_v33 = vpack.c.bf16 %v1370_v29, %v1369_v28  ;;  %v38_v34 = vld [vmem:[%s2066_s1 + $0x8] sm:$0xff]  ;;  %v1372_v39 = vld [vmem:[%s2064_s6 + $0x38] sm:$0xff] }
   0x9   :  { %1635 = vmatpush3.bf16.msra.mxu0 %v1632_v7  ;;  %v1672_v40 = vpack.c.bf16 %v1372_v39, %v1371_v37  ;;  %v515_v41 = vld [vmem:[%s2067_s5] sm:$0xff]  ;;  %v516_v42 = vld [vmem:[%s2067_s5 + $0x8] sm:$0xff]  ;;  %v517_v52 = vld [vmem:[%s2067_s5 + $0x10] sm:$0xff] }
   0xa   :  { %1643 = vmatpush3.bf16.msra.mxu1 %v1640_v12  ;;  %1519 = vmatprep.subr.mxu0 %v1756_v14  ;;  %v1652_v43 = vpack.c.bf16 %v516_v42, %v515_v41  ;;  %v1365_v44 = vld [vmem:[%s2067_s5 + $0x20] sm:$0xff]  ;;  %v1366_v45 = vld [vmem:[%s2067_s5 + $0x28] sm:$0xff]  ;;  %v518_v54 = vld [vmem:[%s2067_s5 + $0x18] sm:$0xff] }
   0xb   :  { %1509 = vmatprep.subr.mxu1 %v1756_v14  ;;  %v1676_v46 = vpack.c.bf16 %v1366_v45, %v1365_v44  ;;  %v1367_v55 = vld [vmem:[%s2067_s5 + $0x30] sm:$0xff]  ;;  %v1368_v56 = vld [vmem:[%s2067_s5 + $0x38] sm:$0xff]  ;;  %v1656_v58 = vpack.c.bf16 %v518_v54, %v517_v52  ;;  %v694_v60 = vld [vmem:[%s2068_s7] sm:$0xff] }
   0xc   :  { %1496 = vmatmul.mubr.msk.f32.vlgmr.msra.gmra.mrb[0].mxu0 %vm52_vm0, %v1849_v13  ;;  %v1680_v59 = vpack.c.bf16 %v1368_v56, %v1367_v55  ;;  %v695_v61 = vld [vmem:[%s2068_s7 + $0x8] sm:$0xff]  ;;  %v1379_v63 = vld [vmem:[%s2068_s7 + $0x20] sm:$0xff]  ;;  %v696_v3 = vld [vmem:[%s2068_s7 + $0x10] sm:$0xff] }
   0xd   :  { %1507 = vmatmul.mubr.msk.f32.vlgmr.msra.gmra.mrb[0].mxu1 %vm52_vm0, %v1849_v13  ;;  %1521 = vmatprep.mubr.msk.f32.mxu0 %vm1757_vm1, %v1756_v14  ;;  %v1380_v0 = vld [vmem:[%s2068_s7 + $0x28] sm:$0xff]  ;;  %v1660_v1 = vpack.c.bf16 %v695_v61, %v694_v60  ;;  %v697_v4 = vld [vmem:[%s2068_s7 + $0x18] sm:$0xff]  ;;  %v1381_v5 = vld [vmem:[%s2068_s7 + $0x30] sm:$0xff] }
   0xe   :  { %1511 = vmatprep.mubr.msk.f32.mxu1 %vm1757_vm1, %v1756_v14  ;;  %v1684_v2 = vpack.c.bf16 %v1380_v0, %v1379_v63  ;;  %v1382_v6 = vld [vmem:[%s2068_s7 + $0x38] sm:$0xff]  ;;  %v1664_v7 = vpack.c.bf16 %v697_v4, %v696_v3  ;;  %v1391_v10 = vld [vmem:[%s2064_s6 + $0x40] sm:$0xff]  ;;  %v1392_v11 = vld [vmem:[%s2064_s6 + $0x48] sm:$0xff] }
   0xf   :  { %v1688_v8 = vpack.c.bf16 %v1382_v6, %v1381_v5  ;;  %v1401_v12 = vld [vmem:[%s2068_s7 + $0x40] sm:$0xff]  ;;  %v1404_v20 = vld [vmem:[%s2068_s7 + $0x58] sm:$0xff] }
  0x10   :  { %v1361_v29 = vld [vmem:[%s2069_s8] ss:$0 sm:$0xff] }
  0xdf   :  { %v1497_v16 = vpop.f32.mrb[0].mxu0 }
  0xe0   :  { %v125_v18 = vpop.f32.mrb[1].mxu0  ;;  %v1508_v19 = vpop.f32.mrb[0].mxu1  ;;  %v131_v26 = vadd.f32 %v1497_v16, %v1342_v15  ;;  %v1393_v16 = vld [vmem:[%s2064_s6 + $0x50] sm:$0xff] }
  0xe1   :  { %v126_v22 = vadd.f32 %v1342_v15, %v125_v18  ;;  %v213_v24 = vpop.f32.mrb[1].mxu1  ;;  %v219_v31 = vadd.f32 %v1508_v19, %v1350_v17  ;;  %v1692_v15 = vpack.c.bf16 %v1392_v11, %v1391_v10  ;;  %v1403_v19 = vld [vmem:[%s2068_s7 + $0x50] sm:$0xff] }
  0xe2   :  { %v214_v25 = vadd.f32 %v1350_v17, %v213_v24  ;;  %v1394_v17 = vld [vmem:[%s2064_s6 + $0x58] sm:$0xff]  ;;  %v1712_v24 = vpack.c.bf16 %v1404_v20, %v1403_v19 }
  0xe3   :  { %1510 = vmatpush3.msra.mxu1 %v126_v22  ;;  %v1696_v21 = vpack.c.bf16 %v1394_v17, %v1393_v16  ;;  %v1387_v22 = vld [vmem:[%s2067_s5 + $0x40] sm:$0xff] }
  0xe4   :  { %1512 = vmatmul.mubr.msk.f32.vlgmr.msra.gmra.mrb[2].mxu1 %vm222_vm2, %v35_v23  ;;  %1514 = vmatprep.subr.mxu1 %v1756_v14  ;;  %v1388_v23 = vld [vmem:[%s2067_s5 + $0x48] sm:$0xff] }
  0xe5   :  { %1515 = vmatpush3.msra.mxu1 %v131_v26  ;;  %1516 = vmatprep.mubr.msk.f32.mxu1 %vm1757_vm1, %v1756_v14  ;;  %v1389_v26 = vld [vmem:[%s2067_s5 + $0x50] sm:$0xff] }
  0xe6   :  { %1524 = vmatprep.subr.mxu1 %v1756_v14  ;;  %1520 = vmatpush3.msra.mxu0 %v214_v25  ;;  %v1700_v25 = vpack.c.bf16 %v1388_v23, %v1387_v22 }
  0xe7   :  { %1522 = vmatmul.mubr.msk.f32.vlgmr.msra.gmra.mrb[2].mxu0 %vm222_vm2, %v37_v30  ;;  %1645 = vmatprep.subr.bf16.mxu0 %v1644_v27 }
  0xe8   :  { %1517 = vmatmul.mubr.msk.f32.vlgmr.msra.gmra.mrb[4].mxu1 %vm222_vm2, %v36_v32  ;;  %1647 = vmatpush3.bf16.msra.mxu0 %v1644_v27  ;;  %v1390_v27 = vld [vmem:[%s2067_s5 + $0x58] sm:$0xff] }
  0xe9   :  { %1525 = vmatpush3.msra.mxu1 %v219_v31  ;;  %1526 = vmatprep.mubr.msk.f32.mxu1 %vm1757_vm1, %v1756_v14  ;;  %v1402_v14 = vld [vmem:[%s2068_s7 + $0x48] sm:$0xff]  ;;  %v1704_v28 = vpack.c.bf16 %v1390_v27, %v1389_v26  ;;  %v1362_v31 = vld [vmem:[%s2070_s9] ss:$0 sm:$0xff] }
  0xea   :  { %1669 = vmatprep.subr.bf16.mxu1 %v1668_v33  ;;  %1649 = vmatprep.subr.bf16.mxu0 %v1648_v38  ;;  %v1708_v18 = vpack.c.bf16 %v1402_v14, %v1401_v12 }
  0xec   :  { %1527 = vmatmul.mubr.msk.f32.vlgmr.msra.gmra.mrb[6].mxu1 %vm222_vm2, %v38_v34  ;;  %1651 = vmatpush3.bf16.msra.mxu0 %v1648_v38  ;;  %v1378_v38 = vld [vmem:[%s2069_s8 + $0x1] ss:$0 sm:$0xff] }
  0xed   :  { %1671 = vmatpush3.bf16.msra.mxu1 %v1668_v33  ;;  %1653 = vmatprep.subr.bf16.mxu0 %v1652_v43 }
  0xee   :  { %1673 = vmatprep.subr.bf16.mxu1 %v1672_v40 }
  0xf1   :  { %1675 = vmatpush3.bf16.msra.mxu1 %v1672_v40 }
  0xf2   :  { %1677 = vmatprep.subr.bf16.mxu1 %v1676_v46 }
 0x1b7   :  { %v1917_v47 = vpop.f32.mrb[2].mxu1 }
 0x1b8   :  { %v1513_v48 = vpop.f32.mrb[3].mxu1 }
 0x1ba   :  { %v1919_v49 = vpop.f32.mrb[2].mxu0 }
 0x1bb   :  { %v1921_v50 = vpop.f32.mrb[4].mxu1  ;;  %1537 = vmatprep.mubr.msk.f32.mxu0 %vm52_vm0, %v1919_v49  ;;  %1570 = vmatprep.mubr.msk.f32.mxu1 %vm52_vm0, %v1919_v49  ;;  %v1523_v51 = vpop.f32.mrb[3].mxu0 }
 0x1bc   :  { %v1518_v53 = vpop.f32.mrb[5].mxu1 }
 0x1bf   :  { %v1939_v57 = vpop.f32.mrb[6].mxu1 }
 0x1c0   :  { %1538 = vmatmul.mubr.msk.f32.vlgmr.msra.gmra.mrb[4].mxu0 %vm52_vm0, %v1939_v57  ;;  %1571 = vmatmul.mubr.msk.f32.vlgmr.msra.gmra.mrb[8].mxu1 %vm52_vm0, %v1939_v57  ;;  %v1528_v62 = vpop.f32.mrb[7].mxu1 }
 0x1c1   :  { %1655 = vmatpush3.bf16.msra.mxu0 %v1652_v43  ;;  %1548 = vmatprep.mubr.msk.f32.mxu0 %vm52_vm0, %v1917_v47  ;;  %v1384_v43 = vld [vmem:[%s2070_s9 + $0x1] ss:$0 sm:$0xff] }
 0x1c2   :  { %1679 = vmatpush3.bf16.msra.mxu1 %v1676_v46  ;;  %1581 = vmatprep.mubr.msk.f32.mxu1 %vm52_vm0, %v1917_v47 }
 0x1c3   :  { %1657 = vmatprep.subr.bf16.mxu0 %v1656_v58  ;;  %1681 = vmatprep.subr.bf16.mxu1 %v1680_v59 }
 0x1c5   :  { %1659 = vmatpush3.bf16.msra.mxu0 %v1656_v58 }
 0x1c6   :  { %1683 = vmatpush3.bf16.msra.mxu1 %v1680_v59  ;;  %1661 = vmatprep.subr.bf16.mxu0 %v1660_v1  ;;  %v1400_v59 = vld [vmem:[%s2069_s8 + $0x2] ss:$0 sm:$0xff] }
 0x1c7   :  { %1685 = vmatprep.subr.bf16.mxu1 %v1684_v2 }
 0x1c8   :  { %1549 = vmatmul.mubr.msk.f32.vlgmr.msra.gmra.mrb[4].mxu0 %vm52_vm0, %v1921_v50 }
 0x1c9   :  { %1663 = vmatpush3.bf16.msra.mxu0 %v1660_v1  ;;  %1582 = vmatmul.mubr.msk.f32.vlgmr.msra.gmra.mrb[8].mxu1 %vm52_vm0, %v1921_v50 }
 0x1ca   :  { %1687 = vmatpush3.bf16.msra.mxu1 %v1684_v2  ;;  %1665 = vmatprep.subr.bf16.mxu0 %v1664_v7 }
 0x1cb   :  { %1689 = vmatprep.subr.bf16.mxu1 %v1688_v8  ;;  %1559 = vmatprep.mubr.msk.f32.mxu0 %vm52_vm0, %v1834_v9 }
 0x1cc   :  { %1592 = vmatprep.mubr.msk.f32.mxu1 %vm52_vm0, %v1834_v9 }
 0x1cd   :  { %1667 = vmatpush3.bf16.msra.mxu0 %v1664_v7 }
 0x1ce   :  { %1691 = vmatpush3.bf16.msra.mxu1 %v1688_v8  ;;  %1693 = vmatprep.subr.bf16.mxu0 %v1692_v15 }
 0x1cf   :  { %1709 = vmatprep.subr.bf16.mxu1 %v1708_v18 }
 0x1d0   :  { %1560 = vmatmul.mubr.msk.f32.vlgmr.msra.gmra.mrb[4].mxu0 %vm52_vm0, %v1849_v13 }
 0x1d1   :  { %1593 = vmatmul.mubr.msk.f32.vlgmr.msra.gmra.mrb[8].mxu1 %vm52_vm0, %v1849_v13  ;;  %1695 = vmatpush3.bf16.msra.mxu0 %v1692_v15 }
 0x1d2   :  { %1603 = vmatprep.mubr.msk.f32.mxu0 %vm52_vm0, %v1919_v49  ;;  %1697 = vmatprep.subr.bf16.mxu0 %v1696_v21 }
 0x1d3   :  { %1711 = vmatpush3.bf16.msra.mxu1 %v1708_v18  ;;  %1625 = vmatprep.mubr.msk.f32.mxu1 %vm52_vm0, %v1834_v9 }
 0x1d4   :  { %1713 = vmatprep.subr.bf16.mxu1 %v1712_v24 }
 0x1d5   :  { %1699 = vmatpush3.bf16.msra.mxu0 %v1696_v21 }
 0x1d6   :  { %1701 = vmatprep.subr.bf16.mxu0 %v1700_v25 }
 0x1d7   :  { %1715 = vmatpush3.bf16.msra.mxu1 %v1712_v24 }
 0x1d8   :  { %1604 = vmatmul.mubr.msk.f32.vlgmr.msra.gmra.mrb[6].mxu0 %vm52_vm0, %v1939_v57  ;;  %v1406_v57 = vld [vmem:[%s2070_s9 + $0x2] ss:$0 sm:$0xff] }
 0x1d9   :  { %1703 = vmatpush3.bf16.msra.mxu0 %v1700_v25  ;;  %1614 = vmatprep.mubr.msk.f32.mxu0 %vm52_vm0, %v1917_v47 }
 0x1da   :  { %1705 = vmatprep.subr.bf16.mxu0 %v1704_v28  ;;  %1626 = vmatmul.mubr.msk.f32.vlgmr.msra.gmra.mrb[10].mxu1 %vm52_vm0, %v1849_v13 }
 0x1dd   :  { %1707 = vmatpush3.bf16.msra.mxu0 %v1704_v28 }
 0x1e0   :  { %1615 = vmatmul.mubr.msk.f32.vlgmr.msra.gmra.mrb[6].mxu0 %vm52_vm0, %v1921_v50 }
 0x2a3   :  { %v1561_v30 = vpop.f32.mrb[4].mxu0 }
 0x2a4   :  { %v1716_v32 = vadd.f32 %v1561_v30, %v1361_v29  ;;  %v1594_v33 = vpop.f32.mrb[8].mxu1  ;;  %v771_v34 = vpop.f32.mrb[5].mxu0 }
 0x2a5   :  { %v1718_v35 = vadd.f32 %v1361_v29, %v771_v34  ;;  %v1029_v36 = vpop.f32.mrb[9].mxu1  ;;  %v1720_v42 = vadd.f32 %v1594_v33, %v1378_v38 }
 0x2a6   :  { %v1717_v37 = vadd.f32 %v1716_v32, %v1362_v31  ;;  %v1722_v44 = vadd.f32 %v1378_v38, %v1029_v36 }
 0x2a7   :  { %v1719_v39 = vadd.f32 %v1718_v35, %v1362_v31  ;;  %v1721_v46 = vadd.f32 %v1720_v42, %v1384_v43 }
 0x2a8   :  { %v1410_v40 = vmul.f32 -1.442695, %v1717_v37  ;;  %v1723_v48 = vadd.f32 %v1722_v44, %v1384_v43 }
 0x2a9   :  { %v1409_v41 = vmul.f32 -1.442695, %v1719_v39  ;;  %v1412_v49 = vmul.f32 -1.442695, %v1721_v46 }
 0x2aa   :  { %1736 = vpow2.f32 %v1410_v40  ;;  %v1411_v52 = vmul.f32 -1.442695, %v1723_v48 }
 0x2ab   :  { %1738 = vpow2.f32 %v1409_v41 }
 0x2ac   :  { %1740 = vpow2.f32 %v1412_v49 }
 0x2ad   :  { %v1627_v45 = vpop.f32.mrb[10].mxu1 }
 0x2ae   :  { %v1287_v47 = vpop.f32.mrb[11].mxu1  ;;  %v1293_v58 = vadd.f32 %v1627_v45, %v1406_v57 }
 0x2af   :  { %v1288_v61 = vadd.f32 %v1406_v57, %v1287_v47 }
 0x2b3   :  { %v1616_v50 = vpop.f32.mrb[6].mxu0 }
 0x2b4   :  { %v1737_v51 = vpop.eup %1736  ;;  %v1189_v53 = vpop.f32.mrb[7].mxu0  ;;  %v1207_v0 = vadd.f32 %v1616_v50, %v1400_v59 }
 0x2b5   :  { %v1305_v54 = vadd.f32 1.0, %v1737_v51  ;;  %v1739_v55 = vpop.eup %1738  ;;  %v1206_v4 = vadd.f32 %v1400_v59, %v1189_v53 }
 0x2b6   :  { %v1304_v56 = vadd.f32 1.0, %v1739_v55  ;;  %v1741_v60 = vpop.eup %1740 }
 0x2b7   :  { %1742 = vrcp.f32 %v1305_v54  ;;  %v1319_v3 = vadd.f32 1.0, %v1741_v60 }
 0x2b8   :  { %1744 = vpow2.f32 %v1411_v52 }
 0x2b9   :  { %1746 = vrcp.f32 %v1304_v56 }
 0x2c1   :  { %v1743_v62 = vpop.eup %1742 }
 0x2c2   :  { %v1745_v63 = vpop.eup %1744  ;;  %v1325_v1 = vmul.f32 %v1743_v62, %v1293_v58 }
 0x2c3   :  { %v1747_v2 = vpop.eup %1746  ;;  %v1318_v7 = vadd.f32 1.0, %v1745_v63 }
 0x2c4   :  { %v1327_v5 = vadd.f32 %v1325_v1, %v1207_v0  ;;  %v1324_v6 = vmul.f32 %v1747_v2, %v1288_v61 }
 0x2c6   :  { %1748 = vtanh.f32 %v1327_v5  ;;  %v1326_v8 = vadd.f32 %v1324_v6, %v1206_v4 }
 0x2c7   :  { %1750 = vrcp.f32 %v1319_v3 }
 0x2c8   :  { %1752 = vtanh.f32 %v1326_v8 }
 0x2c9   :  { %1754 = vrcp.f32 %v1318_v7 }
 0x2d0   :  { %v1749_v10 = vpop.eup %1748 }
 0x2d1   :  { %v1751_v11 = vpop.eup %1750  ;;  %v1331_v12 = vsub.f32 %v1849_v13, %v1749_v10 }
 0x2d2   :  { %v1753_v14 = vpop.eup %1752 }
 0x2d3   :  { %v1333_v15 = vmul.f32 %v1751_v11, %v1331_v12  ;;  %v1330_v16 = vsub.f32 %v1834_v9, %v1753_v14  ;;  %v1755_v17 = vpop.eup %1754 }
 0x2d5   :  { %v1335_v18 = vadd.f32 %v1749_v10, %v1333_v15  ;;  %v1332_v19 = vmul.f32 %v1755_v17, %v1330_v16 }
 0x2d7   :  { %1337 = vst.msk [vmem:[%s2071_s10 + $0x8] sm:$0xff] %vm52_vm0, %v1335_v18  ;;  %v1334_v20 = vadd.f32 %v1753_v14, %v1332_v19 }
 0x2d9   :  { %1336 = vst.msk [vmem:[%s2071_s10] sm:$0xff] %vm52_vm0, %v1334_v20 }

</bundles_post_ra>
